<compile_context>
chip_gen: v5e
topology: v5e:2x2
jax: 0.10.0
libtpu: 0.0.40
codegen_flags: <defaults>
</compile_context>

<pallas_src>
import functools
import math

import numpy as np
import jax
import jax.numpy as jnp
from jax import lax
from jax.experimental import pallas as pl
from jax.experimental.pallas import tpu as pltpu


# -----------------------------------------------------------------------------
# Fused kernel: projections + masked query-axis softmax + P@V + raw-view + Wo
# -----------------------------------------------------------------------------
def _mha_fused_kernel(q_ref, k_ref, v_ref, m_ref,
                      wq_ref, bq_ref, wk_ref, bk_ref, wv_ref, bv_ref,
                      wo_ref, bo_ref, o_ref, *, num_heads, scale):
    """Per-batch fused MHA.

    q_ref/k_ref/v_ref : (1, S, D)   bf16
    m_ref             : (1, Sq, Sk) bf16 (exact 0/1 values)
    w*_ref            : (D, D)      bf16 (already transposed: x @ W)
    b*_ref            : (1, D)      f32
    o_ref             : (1, Sq, D)  f32  (lane-dense)
    """
    q = q_ref[0]                       # (Sq, D) bf16
    k = k_ref[0]                       # (Sk, D) bf16
    v = v_ref[0]                       # (Sk, D) bf16
    Sq, D = q.shape
    Sk = k.shape[0]
    H = num_heads
    dk = D // H

    # Full-width projections: one (S, D) @ (D, D) MXU matmul each, f32 accum.
    qp = jnp.dot(q, wq_ref[...], preferred_element_type=jnp.float32) + bq_ref[...]
    kp = jnp.dot(k, wk_ref[...], preferred_element_type=jnp.float32) + bk_ref[...]
    vp = jnp.dot(v, wv_ref[...], preferred_element_type=jnp.float32) + bv_ref[...]

    masked = m_ref[0] == 0             # (Sq, Sk) bool, hoisted out of head loop

    # Per-head attention via static lane slices of the projected activations.
    att_heads = []
    for h in range(H):                 # H is small and static -> unrolled
        qh = qp[:, h * dk:(h + 1) * dk].astype(jnp.bfloat16)   # (Sq, dk)
        kh = kp[:, h * dk:(h + 1) * dk].astype(jnp.bfloat16)   # (Sk, dk)
        vh = vp[:, h * dk:(h + 1) * dk].astype(jnp.bfloat16)   # (Sk, dk)

        # Scores (Sq, Sk): contract on dk without materializing kh.T.
        s = lax.dot_general(qh, kh, (((1,), (1,)), ((), ())),
                            preferred_element_type=jnp.float32) * scale
        s = jnp.where(masked, -1e9, s)

        # Reference uses F.softmax(dim=2) on (B, H, q, k): normalize over the
        # QUERY axis, which is axis 0 of this per-head (Sq, Sk) tile.
        s = s - jnp.max(s, axis=0, keepdims=True)
        e = jnp.exp(s)
        p = e * pl.reciprocal(jnp.sum(e, axis=0, keepdims=True), approx=True)

        att_heads.append(jnp.dot(p.astype(jnp.bfloat16), vh,
                                 preferred_element_type=jnp.float32))  # (Sq, dk)

    # Torch quirk: `.view(B, Sq, H*dk)` on the contiguous (B, H, Sq, dk) tensor
    # is a raw row-major reinterpretation (NOT a head transpose).  Assemble that
    # (Sq, H*dk) slab here with static slices + concatenates so the HBM store is
    # lane-dense and the output projection can be fused below.
    rows = []
    for r in range(Sq):
        pieces = []
        for j in range(H):
            c = r * H + j              # flat dk-chunk index into (H, Sq, dk)
            h_idx, s_idx = c // Sq, c % Sq
            pieces.append(att_heads[h_idx][s_idx:s_idx + 1, :])
        rows.append(jnp.concatenate(pieces, axis=1))       # (1, D)
    concat = jnp.concatenate(rows, axis=0).astype(jnp.bfloat16)   # (Sq, D)

    # Fused output projection: (Sq, D) @ (D, D) + bias, f32 accumulation.
    o_ref[0] = (jnp.dot(concat, wo_ref[...], preferred_element_type=jnp.float32)
                + bo_ref[...]).astype(o_ref.dtype)


# -----------------------------------------------------------------------------
# Wrapper (forward pass of the nn.Module)
# -----------------------------------------------------------------------------
def multi_head_attention(params, q, k, v, mask, num_heads):
    B, Sq, D = q.shape
    Sk = k.shape[1]
    dk = D // num_heads
    scale = 1.0 / math.sqrt(dk)

    # Host-side (tiny, one-time) weight prep: torch (out, in) -> (in, out) bf16
    # so the kernel computes x @ W; biases as (1, D) f32.
    to_w = lambda w: w.T.astype(jnp.bfloat16)
    to_b = lambda b: b.reshape(1, -1).astype(jnp.float32)

    kernel = functools.partial(_mha_fused_kernel, num_heads=num_heads, scale=scale)

    batch_spec = lambda shape: pl.BlockSpec(shape, lambda b: (b, 0, 0))
    shared_spec = lambda shape: pl.BlockSpec(shape, lambda b: (0, 0))

    out = pl.pallas_call(
        kernel,
        grid=(B,),
        in_specs=[
            batch_spec((1, Sq, D)),        # q
            batch_spec((1, Sk, D)),        # k
            batch_spec((1, Sk, D)),        # v
            batch_spec((1, Sq, Sk)),       # mask (bf16, exact 0/1)
            shared_spec((D, D)), shared_spec((1, D)),   # wq, bq
            shared_spec((D, D)), shared_spec((1, D)),   # wk, bk
            shared_spec((D, D)), shared_spec((1, D)),   # wv, bv
            shared_spec((D, D)), shared_spec((1, D)),   # wo, bo
        ],
        out_specs=batch_spec((1, Sq, D)),
        out_shape=jax.ShapeDtypeStruct((B, Sq, D), jnp.float32),
        compiler_params=pltpu.CompilerParams(dimension_semantics=("parallel",)),
    )(q.astype(jnp.bfloat16), k.astype(jnp.bfloat16), v.astype(jnp.bfloat16),
      mask.astype(jnp.bfloat16),
      to_w(params["wq"]), to_b(params["bq"]),
      to_w(params["wk"]), to_b(params["bk"]),
      to_w(params["wv"]), to_b(params["bv"]),
      to_w(params["wo"]), to_b(params["bo"]))
    return out


# -----------------------------------------------------------------------------
# Pure-JAX f32 reference (faithful to the PyTorch forward, incl. its quirks)
# -----------------------------------------------------------------------------
def mha_reference(params, q, k, v, mask, num_heads):
    B, Sq, D = q.shape
    Sk = k.shape[1]
    dk = D // num_heads

    def lin(x, w, b):
        return x @ w.T + b

    qp = lin(q, params["wq"], params["bq"]).reshape(B, Sq, num_heads, dk).transpose(0, 2, 1, 3)
    kp = lin(k, params["wk"], params["bk"]).reshape(B, Sk, num_heads, dk).transpose(0, 2, 1, 3)
    vp = lin(v, params["wv"], params["bv"]).reshape(B, Sk, num_heads, dk).transpose(0, 2, 1, 3)
    s = jnp.einsum("bhqd,bhkd->bhqk", qp, kp) / math.sqrt(dk)
    s = jnp.where(mask[:, None] == 0, -1e9, s)
    p = jax.nn.softmax(s, axis=2)                       # torch F.softmax(dim=2): query axis
    attn = jnp.einsum("bhqk,bhkd->bhqd", p, vp)
    concat = attn.reshape(B, Sq, num_heads * dk)        # torch raw .view quirk
    return lin(concat, params["wo"], params["bo"])


def init_params(key, d_model):
    ks = jax.random.split(key, 8)
    std = 1.0 / math.sqrt(d_model)

    def w(k):
        return (std * jax.random.normal(k, (d_model, d_model))).astype(jnp.float32)

    def b(k):
        return (0.1 * jax.random.normal(k, (d_model,))).astype(jnp.float32)

    return {"wq": w(ks[0]), "bq": b(ks[1]),
            "wk": w(ks[2]), "bk": b(ks[3]),
            "wv": w(ks[4]), "bv": b(ks[5]),
            "wo": w(ks[6]), "bo": b(ks[7])}


# -----------------------------------------------------------------------------
if __name__ == "__main__":
    batch, seq, d_model, num_heads = 2, 8, 32, 4

    key = jax.random.PRNGKey(0)
    kq, kk, kv, kp = jax.random.split(key, 4)
    q = jax.random.normal(kq, (batch, seq, d_model), dtype=jnp.float32)
    k = jax.random.normal(kk, (batch, seq, d_model), dtype=jnp.float32)
    v = jax.random.normal(kv, (batch, seq, d_model), dtype=jnp.float32)
    # Non-trivial (causal) mask so the masked_fill path is actually exercised.
    mask = jnp.broadcast_to(jnp.tril(jnp.ones((seq, seq), jnp.float32)),
                            (batch, seq, seq))
    params = init_params(kp, d_model)

    fwd = jax.jit(functools.partial(multi_head_attention, num_heads=num_heads))
    out = jax.block_until_ready(fwd(params, q, k, v, mask))

    ref = mha_reference(params, q, k, v, mask, num_heads)

    assert out.shape == (batch, seq, d_model), out.shape
    assert bool(jnp.all(jnp.isfinite(out)))
    # Loose tolerance: kernel uses bf16 MXU operands with f32 accumulation.
    np.testing.assert_allclose(np.asarray(out), np.asarray(ref), atol=0.1, rtol=0.1)
    print("KERNEL_OK")
</pallas_src>

<mosaic_0001>
module attributes {stable_mosaic.version = 11 : i64} {
  func.func @_mha_fused_kernel(%arg0: i32, %arg1: memref<1x8x32xbf16, #tpu.memory_space<vmem>>, %arg2: memref<1x8x32xbf16, #tpu.memory_space<vmem>>, %arg3: memref<1x8x32xbf16, #tpu.memory_space<vmem>>, %arg4: memref<1x8x8xbf16, #tpu.memory_space<vmem>>, %arg5: memref<32x32xbf16, #tpu.memory_space<vmem>>, %arg6: memref<1x32xf32, #tpu.memory_space<vmem>>, %arg7: memref<32x32xbf16, #tpu.memory_space<vmem>>, %arg8: memref<1x32xf32, #tpu.memory_space<vmem>>, %arg9: memref<32x32xbf16, #tpu.memory_space<vmem>>, %arg10: memref<1x32xf32, #tpu.memory_space<vmem>>, %arg11: memref<32x32xbf16, #tpu.memory_space<vmem>>, %arg12: memref<1x32xf32, #tpu.memory_space<vmem>>, %arg13: memref<1x8x32xf32, #tpu.memory_space<vmem>>) attributes {dimension_semantics = [#tpu.dimension_semantics<parallel>], iteration_bounds = array<i64: 2>, scalar_prefetch = 0 : i64, scratch_operands = 0 : i64, tpu.core_type = #tpu.core_type<tc>, window_params = [{transform_indices = @transform_0, window_bounds = array<i64: 1, 8, 32>}, {transform_indices = @transform_1, window_bounds = array<i64: 1, 8, 32>}, {transform_indices = @transform_2, window_bounds = array<i64: 1, 8, 32>}, {transform_indices = @transform_3, window_bounds = array<i64: 1, 8, 8>}, {pipeline_mode = #tpu.pipeline_mode<synchronous>, transform_indices = @transform_4, window_bounds = array<i64: 32, 32>}, {pipeline_mode = #tpu.pipeline_mode<synchronous>, transform_indices = @transform_5, window_bounds = array<i64: 1, 32>}, {pipeline_mode = #tpu.pipeline_mode<synchronous>, transform_indices = @transform_6, window_bounds = array<i64: 32, 32>}, {pipeline_mode = #tpu.pipeline_mode<synchronous>, transform_indices = @transform_7, window_bounds = array<i64: 1, 32>}, {pipeline_mode = #tpu.pipeline_mode<synchronous>, transform_indices = @transform_8, window_bounds = array<i64: 32, 32>}, {pipeline_mode = #tpu.pipeline_mode<synchronous>, transform_indices = @transform_9, window_bounds = array<i64: 1, 32>}, {pipeline_mode = #tpu.pipeline_mode<synchronous>, transform_indices = @transform_10, window_bounds = array<i64: 32, 32>}, {pipeline_mode = #tpu.pipeline_mode<synchronous>, transform_indices = @transform_11, window_bounds = array<i64: 1, 32>}, {transform_indices = @transform_12, window_bounds = array<i64: 1, 8, 32>}]} {
    %c0 = arith.constant 0 : index
    %c0_0 = arith.constant 0 : index
    %c0_1 = arith.constant 0 : index
    %0 = vector.load %arg1[%c0, %c0_0, %c0_1] : memref<1x8x32xbf16, #tpu.memory_space<vmem>>, vector<1x8x32xbf16>
    %1 = vector.shape_cast %0 : vector<1x8x32xbf16> to vector<8x32xbf16>
    %c0_2 = arith.constant 0 : index
    %c0_3 = arith.constant 0 : index
    %c0_4 = arith.constant 0 : index
    %2 = vector.load %arg2[%c0_2, %c0_3, %c0_4] : memref<1x8x32xbf16, #tpu.memory_space<vmem>>, vector<1x8x32xbf16>
    %3 = vector.shape_cast %2 : vector<1x8x32xbf16> to vector<8x32xbf16>
    %c0_5 = arith.constant 0 : index
    %c0_6 = arith.constant 0 : index
    %c0_7 = arith.constant 0 : index
    %4 = vector.load %arg3[%c0_5, %c0_6, %c0_7] : memref<1x8x32xbf16, #tpu.memory_space<vmem>>, vector<1x8x32xbf16>
    %5 = vector.shape_cast %4 : vector<1x8x32xbf16> to vector<8x32xbf16>
    %c0_8 = arith.constant 0 : index
    %c0_9 = arith.constant 0 : index
    %6 = vector.load %arg5[%c0_8, %c0_9] : memref<32x32xbf16, #tpu.memory_space<vmem>>, vector<32x32xbf16>
    %cst = arith.constant dense<0.000000e+00> : vector<8x32xf32>
    %7 = tpu.matmul %1, %6, %cst {dimension_numbers = #tpu.dot_dimension_numbers<[1], [0], [0], [1], [0, 0, 1, 1], [], []>} : vector<8x32xbf16>, vector<32x32xbf16>, vector<8x32xf32> -> vector<8x32xf32>
    %c0_10 = arith.constant 0 : index
    %c0_11 = arith.constant 0 : index
    %8 = vector.load %arg6[%c0_10, %c0_11] : memref<1x32xf32, #tpu.memory_space<vmem>>, vector<1x32xf32>
    %9 = vector.broadcast %8 : vector<1x32xf32> to vector<8x32xf32>
    %10 = arith.addf %7, %9 : vector<8x32xf32>
    %c0_12 = arith.constant 0 : index
    %c0_13 = arith.constant 0 : index
    %11 = vector.load %arg7[%c0_12, %c0_13] : memref<32x32xbf16, #tpu.memory_space<vmem>>, vector<32x32xbf16>
    %cst_14 = arith.constant dense<0.000000e+00> : vector<8x32xf32>
    %12 = tpu.matmul %3, %11, %cst_14 {dimension_numbers = #tpu.dot_dimension_numbers<[1], [0], [0], [1], [0, 0, 1, 1], [], []>} : vector<8x32xbf16>, vector<32x32xbf16>, vector<8x32xf32> -> vector<8x32xf32>
    %c0_15 = arith.constant 0 : index
    %c0_16 = arith.constant 0 : index
    %13 = vector.load %arg8[%c0_15, %c0_16] : memref<1x32xf32, #tpu.memory_space<vmem>>, vector<1x32xf32>
    %14 = vector.broadcast %13 : vector<1x32xf32> to vector<8x32xf32>
    %15 = arith.addf %12, %14 : vector<8x32xf32>
    %c0_17 = arith.constant 0 : index
    %c0_18 = arith.constant 0 : index
    %16 = vector.load %arg9[%c0_17, %c0_18] : memref<32x32xbf16, #tpu.memory_space<vmem>>, vector<32x32xbf16>
    %cst_19 = arith.constant dense<0.000000e+00> : vector<8x32xf32>
    %17 = tpu.matmul %5, %16, %cst_19 {dimension_numbers = #tpu.dot_dimension_numbers<[1], [0], [0], [1], [0, 0, 1, 1], [], []>} : vector<8x32xbf16>, vector<32x32xbf16>, vector<8x32xf32> -> vector<8x32xf32>
    %c0_20 = arith.constant 0 : index
    %c0_21 = arith.constant 0 : index
    %18 = vector.load %arg10[%c0_20, %c0_21] : memref<1x32xf32, #tpu.memory_space<vmem>>, vector<1x32xf32>
    %19 = vector.broadcast %18 : vector<1x32xf32> to vector<8x32xf32>
    %20 = arith.addf %17, %19 : vector<8x32xf32>
    %c0_22 = arith.constant 0 : index
    %c0_23 = arith.constant 0 : index
    %c0_24 = arith.constant 0 : index
    %21 = vector.load %arg4[%c0_22, %c0_23, %c0_24] : memref<1x8x8xbf16, #tpu.memory_space<vmem>>, vector<1x8x8xbf16>
    %22 = vector.shape_cast %21 : vector<1x8x8xbf16> to vector<8x8xbf16>
    %cst_25 = arith.constant 0.000000e+00 : bf16
    %23 = vector.broadcast %cst_25 : bf16 to vector<8x8xbf16>
    %24 = arith.cmpf oeq, %22, %23 : vector<8x8xbf16>
    %25 = vector.extract_strided_slice %10 {offsets = [0, 0], sizes = [8, 8], strides = [1, 1]} : vector<8x32xf32> to vector<8x8xf32>
    %26 = arith.truncf %25 : vector<8x8xf32> to vector<8x8xbf16>
    %27 = vector.extract_strided_slice %15 {offsets = [0, 0], sizes = [8, 8], strides = [1, 1]} : vector<8x32xf32> to vector<8x8xf32>
    %28 = arith.truncf %27 : vector<8x8xf32> to vector<8x8xbf16>
    %29 = vector.extract_strided_slice %20 {offsets = [0, 0], sizes = [8, 8], strides = [1, 1]} : vector<8x32xf32> to vector<8x8xf32>
    %30 = arith.truncf %29 : vector<8x8xf32> to vector<8x8xbf16>
    %cst_26 = arith.constant dense<0.000000e+00> : vector<8x8xf32>
    %31 = tpu.matmul %26, %28, %cst_26 {dimension_numbers = #tpu.dot_dimension_numbers<[1], [1], [0], [0], [0, 0, 1, 0], [], []>} : vector<8x8xbf16>, vector<8x8xbf16>, vector<8x8xf32> -> vector<8x8xf32>
    %cst_27 = arith.constant 0.353553385 : f32
    %32 = vector.broadcast %cst_27 : f32 to vector<8x8xf32>
    %33 = arith.mulf %31, %32 : vector<8x8xf32>
    %cst_28 = arith.constant -1.000000e+09 : f32
    %34 = vector.broadcast %cst_28 : f32 to vector<8x8xf32>
    %35 = arith.select %24, %34, %33 : vector<8x8xi1>, vector<8x8xf32>
    %cst_29 = arith.constant dense<0xFF800000> : vector<8xf32>
    %36 = vector.multi_reduction <maximumf>, %35, %cst_29 [0] : vector<8x8xf32> to vector<8xf32>
    %37 = vector.shape_cast %36 : vector<8xf32> to vector<1x8xf32>
    %38 = vector.broadcast %37 : vector<1x8xf32> to vector<8x8xf32>
    %39 = arith.subf %35, %38 : vector<8x8xf32>
    %40 = math.exp %39 : vector<8x8xf32>
    %cst_30 = arith.constant dense<0.000000e+00> : vector<8xf32>
    %41 = vector.multi_reduction <add>, %40, %cst_30 [0] : vector<8x8xf32> to vector<8xf32>
    %42 = vector.shape_cast %41 : vector<8xf32> to vector<1x8xf32>
    %43 = tpu.reciprocal %42 {approx = true} : vector<1x8xf32> -> vector<1x8xf32>
    %44 = vector.broadcast %43 : vector<1x8xf32> to vector<8x8xf32>
    %45 = arith.mulf %40, %44 : vector<8x8xf32>
    %46 = arith.truncf %45 : vector<8x8xf32> to vector<8x8xbf16>
    %cst_31 = arith.constant dense<0.000000e+00> : vector<8x8xf32>
    %47 = tpu.matmul %46, %30, %cst_31 {dimension_numbers = #tpu.dot_dimension_numbers<[1], [0], [0], [1], [0, 0, 1, 1], [], []>} : vector<8x8xbf16>, vector<8x8xbf16>, vector<8x8xf32> -> vector<8x8xf32>
    %48 = vector.extract_strided_slice %10 {offsets = [0, 8], sizes = [8, 8], strides = [1, 1]} : vector<8x32xf32> to vector<8x8xf32>
    %49 = arith.truncf %48 : vector<8x8xf32> to vector<8x8xbf16>
    %50 = vector.extract_strided_slice %15 {offsets = [0, 8], sizes = [8, 8], strides = [1, 1]} : vector<8x32xf32> to vector<8x8xf32>
    %51 = arith.truncf %50 : vector<8x8xf32> to vector<8x8xbf16>
    %52 = vector.extract_strided_slice %20 {offsets = [0, 8], sizes = [8, 8], strides = [1, 1]} : vector<8x32xf32> to vector<8x8xf32>
    %53 = arith.truncf %52 : vector<8x8xf32> to vector<8x8xbf16>
    %cst_32 = arith.constant dense<0.000000e+00> : vector<8x8xf32>
    %54 = tpu.matmul %49, %51, %cst_32 {dimension_numbers = #tpu.dot_dimension_numbers<[1], [1], [0], [0], [0, 0, 1, 0], [], []>} : vector<8x8xbf16>, vector<8x8xbf16>, vector<8x8xf32> -> vector<8x8xf32>
    %cst_33 = arith.constant 0.353553385 : f32
    %55 = vector.broadcast %cst_33 : f32 to vector<8x8xf32>
    %56 = arith.mulf %54, %55 : vector<8x8xf32>
    %cst_34 = arith.constant -1.000000e+09 : f32
    %57 = vector.broadcast %cst_34 : f32 to vector<8x8xf32>
    %58 = arith.select %24, %57, %56 : vector<8x8xi1>, vector<8x8xf32>
    %cst_35 = arith.constant dense<0xFF800000> : vector<8xf32>
    %59 = vector.multi_reduction <maximumf>, %58, %cst_35 [0] : vector<8x8xf32> to vector<8xf32>
    %60 = vector.shape_cast %59 : vector<8xf32> to vector<1x8xf32>
    %61 = vector.broadcast %60 : vector<1x8xf32> to vector<8x8xf32>
    %62 = arith.subf %58, %61 : vector<8x8xf32>
    %63 = math.exp %62 : vector<8x8xf32>
    %cst_36 = arith.constant dense<0.000000e+00> : vector<8xf32>
    %64 = vector.multi_reduction <add>, %63, %cst_36 [0] : vector<8x8xf32> to vector<8xf32>
    %65 = vector.shape_cast %64 : vector<8xf32> to vector<1x8xf32>
    %66 = tpu.reciprocal %65 {approx = true} : vector<1x8xf32> -> vector<1x8xf32>
    %67 = vector.broadcast %66 : vector<1x8xf32> to vector<8x8xf32>
    %68 = arith.mulf %63, %67 : vector<8x8xf32>
    %69 = arith.truncf %68 : vector<8x8xf32> to vector<8x8xbf16>
    %cst_37 = arith.constant dense<0.000000e+00> : vector<8x8xf32>
    %70 = tpu.matmul %69, %53, %cst_37 {dimension_numbers = #tpu.dot_dimension_numbers<[1], [0], [0], [1], [0, 0, 1, 1], [], []>} : vector<8x8xbf16>, vector<8x8xbf16>, vector<8x8xf32> -> vector<8x8xf32>
    %71 = vector.extract_strided_slice %10 {offsets = [0, 16], sizes = [8, 8], strides = [1, 1]} : vector<8x32xf32> to vector<8x8xf32>
    %72 = arith.truncf %71 : vector<8x8xf32> to vector<8x8xbf16>
    %73 = vector.extract_strided_slice %15 {offsets = [0, 16], sizes = [8, 8], strides = [1, 1]} : vector<8x32xf32> to vector<8x8xf32>
    %74 = arith.truncf %73 : vector<8x8xf32> to vector<8x8xbf16>
    %75 = vector.extract_strided_slice %20 {offsets = [0, 16], sizes = [8, 8], strides = [1, 1]} : vector<8x32xf32> to vector<8x8xf32>
    %76 = arith.truncf %75 : vector<8x8xf32> to vector<8x8xbf16>
    %cst_38 = arith.constant dense<0.000000e+00> : vector<8x8xf32>
    %77 = tpu.matmul %72, %74, %cst_38 {dimension_numbers = #tpu.dot_dimension_numbers<[1], [1], [0], [0], [0, 0, 1, 0], [], []>} : vector<8x8xbf16>, vector<8x8xbf16>, vector<8x8xf32> -> vector<8x8xf32>
    %cst_39 = arith.constant 0.353553385 : f32
    %78 = vector.broadcast %cst_39 : f32 to vector<8x8xf32>
    %79 = arith.mulf %77, %78 : vector<8x8xf32>
    %cst_40 = arith.constant -1.000000e+09 : f32
    %80 = vector.broadcast %cst_40 : f32 to vector<8x8xf32>
    %81 = arith.select %24, %80, %79 : vector<8x8xi1>, vector<8x8xf32>
    %cst_41 = arith.constant dense<0xFF800000> : vector<8xf32>
    %82 = vector.multi_reduction <maximumf>, %81, %cst_41 [0] : vector<8x8xf32> to vector<8xf32>
    %83 = vector.shape_cast %82 : vector<8xf32> to vector<1x8xf32>
    %84 = vector.broadcast %83 : vector<1x8xf32> to vector<8x8xf32>
    %85 = arith.subf %81, %84 : vector<8x8xf32>
    %86 = math.exp %85 : vector<8x8xf32>
    %cst_42 = arith.constant dense<0.000000e+00> : vector<8xf32>
    %87 = vector.multi_reduction <add>, %86, %cst_42 [0] : vector<8x8xf32> to vector<8xf32>
    %88 = vector.shape_cast %87 : vector<8xf32> to vector<1x8xf32>
    %89 = tpu.reciprocal %88 {approx = true} : vector<1x8xf32> -> vector<1x8xf32>
    %90 = vector.broadcast %89 : vector<1x8xf32> to vector<8x8xf32>
    %91 = arith.mulf %86, %90 : vector<8x8xf32>
    %92 = arith.truncf %91 : vector<8x8xf32> to vector<8x8xbf16>
    %cst_43 = arith.constant dense<0.000000e+00> : vector<8x8xf32>
    %93 = tpu.matmul %92, %76, %cst_43 {dimension_numbers = #tpu.dot_dimension_numbers<[1], [0], [0], [1], [0, 0, 1, 1], [], []>} : vector<8x8xbf16>, vector<8x8xbf16>, vector<8x8xf32> -> vector<8x8xf32>
    %94 = vector.extract_strided_slice %10 {offsets = [0, 24], sizes = [8, 8], strides = [1, 1]} : vector<8x32xf32> to vector<8x8xf32>
    %95 = arith.truncf %94 : vector<8x8xf32> to vector<8x8xbf16>
    %96 = vector.extract_strided_slice %15 {offsets = [0, 24], sizes = [8, 8], strides = [1, 1]} : vector<8x32xf32> to vector<8x8xf32>
    %97 = arith.truncf %96 : vector<8x8xf32> to vector<8x8xbf16>
    %98 = vector.extract_strided_slice %20 {offsets = [0, 24], sizes = [8, 8], strides = [1, 1]} : vector<8x32xf32> to vector<8x8xf32>
    %99 = arith.truncf %98 : vector<8x8xf32> to vector<8x8xbf16>
    %cst_44 = arith.constant dense<0.000000e+00> : vector<8x8xf32>
    %100 = tpu.matmul %95, %97, %cst_44 {dimension_numbers = #tpu.dot_dimension_numbers<[1], [1], [0], [0], [0, 0, 1, 0], [], []>} : vector<8x8xbf16>, vector<8x8xbf16>, vector<8x8xf32> -> vector<8x8xf32>
    %cst_45 = arith.constant 0.353553385 : f32
    %101 = vector.broadcast %cst_45 : f32 to vector<8x8xf32>
    %102 = arith.mulf %100, %101 : vector<8x8xf32>
    %cst_46 = arith.constant -1.000000e+09 : f32
    %103 = vector.broadcast %cst_46 : f32 to vector<8x8xf32>
    %104 = arith.select %24, %103, %102 : vector<8x8xi1>, vector<8x8xf32>
    %cst_47 = arith.constant dense<0xFF800000> : vector<8xf32>
    %105 = vector.multi_reduction <maximumf>, %104, %cst_47 [0] : vector<8x8xf32> to vector<8xf32>
    %106 = vector.shape_cast %105 : vector<8xf32> to vector<1x8xf32>
    %107 = vector.broadcast %106 : vector<1x8xf32> to vector<8x8xf32>
    %108 = arith.subf %104, %107 : vector<8x8xf32>
    %109 = math.exp %108 : vector<8x8xf32>
    %cst_48 = arith.constant dense<0.000000e+00> : vector<8xf32>
    %110 = vector.multi_reduction <add>, %109, %cst_48 [0] : vector<8x8xf32> to vector<8xf32>
    %111 = vector.shape_cast %110 : vector<8xf32> to vector<1x8xf32>
    %112 = tpu.reciprocal %111 {approx = true} : vector<1x8xf32> -> vector<1x8xf32>
    %113 = vector.broadcast %112 : vector<1x8xf32> to vector<8x8xf32>
    %114 = arith.mulf %109, %113 : vector<8x8xf32>
    %115 = arith.truncf %114 : vector<8x8xf32> to vector<8x8xbf16>
    %cst_49 = arith.constant dense<0.000000e+00> : vector<8x8xf32>
    %116 = tpu.matmul %115, %99, %cst_49 {dimension_numbers = #tpu.dot_dimension_numbers<[1], [0], [0], [1], [0, 0, 1, 1], [], []>} : vector<8x8xbf16>, vector<8x8xbf16>, vector<8x8xf32> -> vector<8x8xf32>
    %117 = vector.extract_strided_slice %47 {offsets = [0, 0], sizes = [1, 8], strides = [1, 1]} : vector<8x8xf32> to vector<1x8xf32>
    %118 = vector.extract_strided_slice %47 {offsets = [1, 0], sizes = [1, 8], strides = [1, 1]} : vector<8x8xf32> to vector<1x8xf32>
    %119 = vector.extract_strided_slice %47 {offsets = [2, 0], sizes = [1, 8], strides = [1, 1]} : vector<8x8xf32> to vector<1x8xf32>
    %120 = vector.extract_strided_slice %47 {offsets = [3, 0], sizes = [1, 8], strides = [1, 1]} : vector<8x8xf32> to vector<1x8xf32>
    %121 = tpu.concatenate %117, %118, %119, %120 in 1 : vector<1x8xf32>, vector<1x8xf32>, vector<1x8xf32>, vector<1x8xf32> -> vector<1x32xf32>
    %122 = vector.extract_strided_slice %47 {offsets = [4, 0], sizes = [1, 8], strides = [1, 1]} : vector<8x8xf32> to vector<1x8xf32>
    %123 = vector.extract_strided_slice %47 {offsets = [5, 0], sizes = [1, 8], strides = [1, 1]} : vector<8x8xf32> to vector<1x8xf32>
    %124 = vector.extract_strided_slice %47 {offsets = [6, 0], sizes = [1, 8], strides = [1, 1]} : vector<8x8xf32> to vector<1x8xf32>
    %125 = vector.extract_strided_slice %47 {offsets = [7, 0], sizes = [1, 8], strides = [1, 1]} : vector<8x8xf32> to vector<1x8xf32>
    %126 = tpu.concatenate %122, %123, %124, %125 in 1 : vector<1x8xf32>, vector<1x8xf32>, vector<1x8xf32>, vector<1x8xf32> -> vector<1x32xf32>
    %127 = vector.extract_strided_slice %70 {offsets = [0, 0], sizes = [1, 8], strides = [1, 1]} : vector<8x8xf32> to vector<1x8xf32>
    %128 = vector.extract_strided_slice %70 {offsets = [1, 0], sizes = [1, 8], strides = [1, 1]} : vector<8x8xf32> to vector<1x8xf32>
    %129 = vector.extract_strided_slice %70 {offsets = [2, 0], sizes = [1, 8], strides = [1, 1]} : vector<8x8xf32> to vector<1x8xf32>
    %130 = vector.extract_strided_slice %70 {offsets = [3, 0], sizes = [1, 8], strides = [1, 1]} : vector<8x8xf32> to vector<1x8xf32>
    %131 = tpu.concatenate %127, %128, %129, %130 in 1 : vector<1x8xf32>, vector<1x8xf32>, vector<1x8xf32>, vector<1x8xf32> -> vector<1x32xf32>
    %132 = vector.extract_strided_slice %70 {offsets = [4, 0], sizes = [1, 8], strides = [1, 1]} : vector<8x8xf32> to vector<1x8xf32>
    %133 = vector.extract_strided_slice %70 {offsets = [5, 0], sizes = [1, 8], strides = [1, 1]} : vector<8x8xf32> to vector<1x8xf32>
    %134 = vector.extract_strided_slice %70 {offsets = [6, 0], sizes = [1, 8], strides = [1, 1]} : vector<8x8xf32> to vector<1x8xf32>
    %135 = vector.extract_strided_slice %70 {offsets = [7, 0], sizes = [1, 8], strides = [1, 1]} : vector<8x8xf32> to vector<1x8xf32>
    %136 = tpu.concatenate %132, %133, %134, %135 in 1 : vector<1x8xf32>, vector<1x8xf32>, vector<1x8xf32>, vector<1x8xf32> -> vector<1x32xf32>
    %137 = vector.extract_strided_slice %93 {offsets = [0, 0], sizes = [1, 8], strides = [1, 1]} : vector<8x8xf32> to vector<1x8xf32>
    %138 = vector.extract_strided_slice %93 {offsets = [1, 0], sizes = [1, 8], strides = [1, 1]} : vector<8x8xf32> to vector<1x8xf32>
    %139 = vector.extract_strided_slice %93 {offsets = [2, 0], sizes = [1, 8], strides = [1, 1]} : vector<8x8xf32> to vector<1x8xf32>
    %140 = vector.extract_strided_slice %93 {offsets = [3, 0], sizes = [1, 8], strides = [1, 1]} : vector<8x8xf32> to vector<1x8xf32>
    %141 = tpu.concatenate %137, %138, %139, %140 in 1 : vector<1x8xf32>, vector<1x8xf32>, vector<1x8xf32>, vector<1x8xf32> -> vector<1x32xf32>
    %142 = vector.extract_strided_slice %93 {offsets = [4, 0], sizes = [1, 8], strides = [1, 1]} : vector<8x8xf32> to vector<1x8xf32>
    %143 = vector.extract_strided_slice %93 {offsets = [5, 0], sizes = [1, 8], strides = [1, 1]} : vector<8x8xf32> to vector<1x8xf32>
    %144 = vector.extract_strided_slice %93 {offsets = [6, 0], sizes = [1, 8], strides = [1, 1]} : vector<8x8xf32> to vector<1x8xf32>
    %145 = vector.extract_strided_slice %93 {offsets = [7, 0], sizes = [1, 8], strides = [1, 1]} : vector<8x8xf32> to vector<1x8xf32>
    %146 = tpu.concatenate %142, %143, %144, %145 in 1 : vector<1x8xf32>, vector<1x8xf32>, vector<1x8xf32>, vector<1x8xf32> -> vector<1x32xf32>
    %147 = vector.extract_strided_slice %116 {offsets = [0, 0], sizes = [1, 8], strides = [1, 1]} : vector<8x8xf32> to vector<1x8xf32>
    %148 = vector.extract_strided_slice %116 {offsets = [1, 0], sizes = [1, 8], strides = [1, 1]} : vector<8x8xf32> to vector<1x8xf32>
    %149 = vector.extract_strided_slice %116 {offsets = [2, 0], sizes = [1, 8], strides = [1, 1]} : vector<8x8xf32> to vector<1x8xf32>
    %150 = vector.extract_strided_slice %116 {offsets = [3, 0], sizes = [1, 8], strides = [1, 1]} : vector<8x8xf32> to vector<1x8xf32>
    %151 = tpu.concatenate %147, %148, %149, %150 in 1 : vector<1x8xf32>, vector<1x8xf32>, vector<1x8xf32>, vector<1x8xf32> -> vector<1x32xf32>
    %152 = vector.extract_strided_slice %116 {offsets = [4, 0], sizes = [1, 8], strides = [1, 1]} : vector<8x8xf32> to vector<1x8xf32>
    %153 = vector.extract_strided_slice %116 {offsets = [5, 0], sizes = [1, 8], strides = [1, 1]} : vector<8x8xf32> to vector<1x8xf32>
    %154 = vector.extract_strided_slice %116 {offsets = [6, 0], sizes = [1, 8], strides = [1, 1]} : vector<8x8xf32> to vector<1x8xf32>
    %155 = vector.extract_strided_slice %116 {offsets = [7, 0], sizes = [1, 8], strides = [1, 1]} : vector<8x8xf32> to vector<1x8xf32>
    %156 = tpu.concatenate %152, %153, %154, %155 in 1 : vector<1x8xf32>, vector<1x8xf32>, vector<1x8xf32>, vector<1x8xf32> -> vector<1x32xf32>
    %157 = tpu.concatenate %121, %126, %131, %136, %141, %146, %151, %156 in 0 : vector<1x32xf32>, vector<1x32xf32>, vector<1x32xf32>, vector<1x32xf32>, vector<1x32xf32>, vector<1x32xf32>, vector<1x32xf32>, vector<1x32xf32> -> vector<8x32xf32>
    %158 = arith.truncf %157 : vector<8x32xf32> to vector<8x32xbf16>
    %c0_50 = arith.constant 0 : index
    %c0_51 = arith.constant 0 : index
    %159 = vector.load %arg11[%c0_50, %c0_51] : memref<32x32xbf16, #tpu.memory_space<vmem>>, vector<32x32xbf16>
    %cst_52 = arith.constant dense<0.000000e+00> : vector<8x32xf32>
    %160 = tpu.matmul %158, %159, %cst_52 {dimension_numbers = #tpu.dot_dimension_numbers<[1], [0], [0], [1], [0, 0, 1, 1], [], []>} : vector<8x32xbf16>, vector<32x32xbf16>, vector<8x32xf32> -> vector<8x32xf32>
    %c0_53 = arith.constant 0 : index
    %c0_54 = arith.constant 0 : index
    %161 = vector.load %arg12[%c0_53, %c0_54] : memref<1x32xf32, #tpu.memory_space<vmem>>, vector<1x32xf32>
    %162 = vector.broadcast %161 : vector<1x32xf32> to vector<8x32xf32>
    %163 = arith.addf %160, %162 : vector<8x32xf32>
    %c0_55 = arith.constant 0 : index
    %c0_56 = arith.constant 0 : index
    %c0_57 = arith.constant 0 : index
    %164 = vector.load %arg13[%c0_55, %c0_56, %c0_57] : memref<1x8x32xf32, #tpu.memory_space<vmem>>, vector<1x8x32xf32>
    %165 = vector.shape_cast %164 : vector<1x8x32xf32> to vector<8x32xf32>
    %166 = vector.shape_cast %163 : vector<8x32xf32> to vector<1x8x32xf32>
    tpu.vector_store %arg13[%c0_55, %c0_56, %c0_57], %166 {strides = array<i32>} : memref<1x8x32xf32, #tpu.memory_space<vmem>>, vector<1x8x32xf32>,
    return
  }
  func.func @transform_0(%arg0: i32) -> (i32, i32, i32) {
    %c0_i32 = arith.constant 0 : i32
    %c0_i32_0 = arith.constant 0 : i32
    %c0_i32_1 = arith.constant 0 : i32
    return %arg0, %c0_i32, %c0_i32_0 : i32, i32, i32
  }
  func.func @transform_1(%arg0: i32) -> (i32, i32, i32) {
    %c0_i32 = arith.constant 0 : i32
    %c0_i32_0 = arith.constant 0 : i32
    %c0_i32_1 = arith.constant 0 : i32
    return %arg0, %c0_i32, %c0_i32_0 : i32, i32, i32
  }
  func.func @transform_2(%arg0: i32) -> (i32, i32, i32) {
    %c0_i32 = arith.constant 0 : i32
    %c0_i32_0 = arith.constant 0 : i32
    %c0_i32_1 = arith.constant 0 : i32
    return %arg0, %c0_i32, %c0_i32_0 : i32, i32, i32
  }
  func.func @transform_3(%arg0: i32) -> (i32, i32, i32) {
    %c0_i32 = arith.constant 0 : i32
    %c0_i32_0 = arith.constant 0 : i32
    %c0_i32_1 = arith.constant 0 : i32
    return %arg0, %c0_i32, %c0_i32_0 : i32, i32, i32
  }
  func.func @transform_4(%arg0: i32) -> (i32, i32) {
    %c0_i32 = arith.constant 0 : i32
    %c0_i32_0 = arith.constant 0 : i32
    %c0_i32_1 = arith.constant 0 : i32
    return %c0_i32, %c0_i32_0 : i32, i32
  }
  func.func @transform_5(%arg0: i32) -> (i32, i32) {
    %c0_i32 = arith.constant 0 : i32
    %c0_i32_0 = arith.constant 0 : i32
    %c0_i32_1 = arith.constant 0 : i32
    return %c0_i32, %c0_i32_0 : i32, i32
  }
  func.func @transform_6(%arg0: i32) -> (i32, i32) {
    %c0_i32 = arith.constant 0 : i32
    %c0_i32_0 = arith.constant 0 : i32
    %c0_i32_1 = arith.constant 0 : i32
    return %c0_i32, %c0_i32_0 : i32, i32
  }
  func.func @transform_7(%arg0: i32) -> (i32, i32) {
    %c0_i32 = arith.constant 0 : i32
    %c0_i32_0 = arith.constant 0 : i32
    %c0_i32_1 = arith.constant 0 : i32
    return %c0_i32, %c0_i32_0 : i32, i32
  }
  func.func @transform_8(%arg0: i32) -> (i32, i32) {
    %c0_i32 = arith.constant 0 : i32
    %c0_i32_0 = arith.constant 0 : i32
    %c0_i32_1 = arith.constant 0 : i32
    return %c0_i32, %c0_i32_0 : i32, i32
  }
  func.func @transform_9(%arg0: i32) -> (i32, i32) {
    %c0_i32 = arith.constant 0 : i32
    %c0_i32_0 = arith.constant 0 : i32
    %c0_i32_1 = arith.constant 0 : i32
    return %c0_i32, %c0_i32_0 : i32, i32
  }
  func.func @transform_10(%arg0: i32) -> (i32, i32) {
    %c0_i32 = arith.constant 0 : i32
    %c0_i32_0 = arith.constant 0 : i32
    %c0_i32_1 = arith.constant 0 : i32
    return %c0_i32, %c0_i32_0 : i32, i32
  }
  func.func @transform_11(%arg0: i32) -> (i32, i32) {
    %c0_i32 = arith.constant 0 : i32
    %c0_i32_0 = arith.constant 0 : i32
    %c0_i32_1 = arith.constant 0 : i32
    return %c0_i32, %c0_i32_0 : i32, i32
  }
  func.func @transform_12(%arg0: i32) -> (i32, i32, i32) {
    %c0_i32 = arith.constant 0 : i32
    %c0_i32_0 = arith.constant 0 : i32
    %c0_i32_1 = arith.constant 0 : i32
    return %arg0, %c0_i32, %c0_i32_0 : i32, i32, i32
  }
}

</mosaic_0001>

<bundles_post_ra>
// kernel: multi_head_attention.1
= control target key start
LH: loop header
LB: loop body
LE: loop exit
PB: predicated region body
PF: predicated region fallthrough
CT: control target
= control target key end

     0   :  { %s1588_s0 = inlined_call_operand.vmem [shape: bf16[2,8,32], index: 0, kind: input, shape index: {}]   ;;  %s1589_s1 = inlined_call_operand.vmem [shape: bf16[2,8,32], index: 1, kind: input, shape index: {}]   ;;  %s1590_s2 = inlined_call_operand.vmem [shape: bf16[2,8,32], index: 2, kind: input, shape index: {}]   ;;  %s1591_s3 = inlined_call_operand.vmem [shape: bf16[2,8,8], index: 3, kind: input, shape index: {}]   ;;  %s1592_s4 = inlined_call_operand.vmem [shape: bf16[32,32], index: 4, kind: input, shape index: {}]   ;;  %s1593_s5 = inlined_call_operand.vmem [shape: f32[1,32], index: 5, kind: input, shape index: {}]   ;;  %s1594_s6 = inlined_call_operand.vmem [shape: bf16[32,32], index: 6, kind: input, shape index: {}]   ;;  %s1595_s7 = inlined_call_operand.vmem [shape: f32[1,32], index: 7, kind: input, shape index: {}]   ;;  %s1596_s8 = inlined_call_operand.vmem [shape: bf16[32,32], index: 8, kind: input, shape index: {}]   ;;  %s1597_s9 = inlined_call_operand.vmem [shape: f32[1,32], index: 9, kind: input, shape index: {}]   ;;  %s1598_s10 = inlined_call_operand.vmem [shape: bf16[32,32], index: 10, kind: input, shape index: {}]   ;;  %s1599_s11 = inlined_call_operand.vmem [shape: f32[1,32], index: 11, kind: input, shape index: {}]   ;;  %s1600_s12 = inlined_call_operand.hbm [shape: f32[2,8,32], index: 12, kind: output, shape index: {}]  }
   0x1   :  { %1602 = sst [smem:[#allocation7_spill]] %s1588_s0 }
   0x2   :  { %1603 = sst [smem:[#allocation8_spill]] %s1589_s1 }
   0x3   :  { %17 = vsyncpa [#allocation3], 0 }
   0x4   :  { %19 = vsyncpa [#allocation3 + $0x1], 0  ;;  %s1383_s21 = smov 0   ;;  %s1385_s22 = smov 0  }
   0x5   :  { %s1387_s23 = smov 0   ;;  %s1389_s24 = smov 0  }
   0x6 LB: > { %1604 = sst [smem:[#allocation5_spill]] %s1306_s23  ;;  %s1404_s25 = sadd.s32 4294967295, %s1310_s24   ;;  %s1310_s24 = sphi %s1389_s24, %s1616_s24   ;;  %s1306_s23 = sphi %s1387_s23, %s1613_s23   ;;  %s1302_s22 = sphi %s1385_s22, %s1615_s22   ;;  %s1298_s21 = sphi %s1383_s21, %s1614_s21  }
   0x7   : > { %s1088_s26 = sadd.s32 4294967294, %s1310_s24   ;;  %s1408_s27 = sadd.s32 1, %s1310_s24  }
   0x8   : > { %s304_s28 = sadd.s32 1, %s1306_s23  ;;  %s301_s29 = ssub.s32 %s1310_s24, %s1408_s27 }
   0x9   : > { %p314_p0 = scmp.ne.s32.totalorder %s1306_s23, %s1302_s22  ;;  %p302_p1 = scmp.eq.s32.totalorder %s301_s29, 0 }
   0xa   : > { %p315_p2 = scmp.eq.s32.totalorder %s1404_s25, 1  ;;  %p320_p3 = scmp.ne.s32.totalorder %s1302_s22, %s1298_s21 }
   0xb   : > { %p321_p4 = scmp.eq.s32.totalorder %s1088_s26, 1  ;;  %p1091_p7 = scmp.ge.s32.totalorder %s1310_s24, 1 }
   0xc   : > { %s1419_s30 = scalar_select %p302_p1, %s1306_s23, %s304_s28  }
   0xd   : > { %p1421_p5 = por %p315_p2, %p314_p0  ;;  %p1425_p6 = por %p321_p4, %p320_p3 }
   0xe   : > { %1605 = sst [smem:[#allocation6_spill]] %s1419_s30  ;;  %p391_p8 = scmp.lt.s32.totalorder %s1310_s24, 3 }
  0x10   : > { %p392_p9 = pnand %p1091_p7, %p391_p8 }
  0x11   : > { %p444_p10 = scmp.lt.s32.totalorder (!%p392_p9), %s1404_s25, 1  ;;  %s1608_s1 = sld [smem:[#allocation8_spill]] (!%p392_p9) }
  0x12   : > { %395 = sbr.rel (%p392_p9) target bundleno = 882 (0x372), region = 68  ;;  %s1609_s0 = sld [smem:[#allocation7_spill]] (!%p392_p9) }
  0x13   : > { %s1313_s30 = smov (!%p392_p9), 120   ;;  %s1314_s28 = smov (!%p392_p9), 104  }
  0x14   : > { %s1317_s20 = smov (!%p392_p9), 8   ;;  %s441_s29 = sand.u32 (!%p392_p9), 1, %s1302_s22  }
  0x17   : > { %v1148_v0 = vld [vmem:[%s1594_s6 + $0x8] sm:$0xff]  ;;  %v1147_v2 = vld [vmem:[%s1594_s6] sm:$0xff]  ;;  %s445_s26 = scalar_select %p444_p10, %s1404_s25, 1  ;;  %vm484_vm0 = vcmask 261120   ;;  %vm579_vm1 = vcmask 64512   ;;  %vm624_vm3 = vcmask 1043456  }
  0x18   : > { %v1146_v1 = vld [vmem:[%s1592_s4 + $0x8] sm:$0xff]  ;;  %530 = vmatpush.bf16.msra.mxu1 %v1148_v0  ;;  %v1145_v3 = vld [vmem:[%s1592_s4] sm:$0xff]  ;;  %vm856_vm4 = vcmask 130048   ;;  %vm858_vm5 = vcmask 195584   ;;  %vm926_vm6 = vcmask 1040384   ;;  %vm928_vm7 = vcmask 1041408  }
  0x19   : > { %494 = vmatpush.bf16.msra.mxu0 %v1146_v1  ;;  %s1445_s15 = sshll.u32 %s445_s26, 2  ;;  %v1150_v6 = vld [vmem:[%s1596_s8 + $0x8] sm:$0xff]  ;;  %v1149_v7 = vld [vmem:[%s1596_s8] sm:$0xff]  ;;  %s1312_s26 = smov 112   ;;  %vm930_vm8 = vcmask 1042432   ;;  %vm933_vm9 = vcmask 1044480  }
  0x1a   : > { %s451_s17 = scalar_lea.vmem %s1608_s1, %s1445_s15  ;;  %s447_s19 = scalar_lea.vmem %s1609_s0, %s1445_s15  ;;  %566 = vmatpush.bf16.msra.mxu2 %v1150_v6  ;;  %v1228_v9 = vld [vmem:[%s1595_s7] ss:$0 sm:$0xff]  ;;  %vm935_vm10 = vcmask 1045504   ;;  %vm937_vm11 = vcmask 1046528  }
  0x1b   : > { %v462_v4 = vld [vmem:[%s451_s17] sm:$0xf]  ;;  %s455_s16 = scalar_lea.vmem %s1590_s2, %s1445_s15  ;;  %s1092_s17 = sshll.u32 %s441_s29, 3 }
  0x1c   : > { %531 = vmatpush.bf16.msra.mxu1 %v1147_v2  ;;  %v461_v5 = vld [vmem:[%s447_s19] sm:$0xf]  ;;  %s1316_s19 = smov 16  }
  0x1d   : > { %495 = vmatpush.bf16.msra.mxu0 %v1145_v3  ;;  %v463_v8 = vld [vmem:[%s455_s16] sm:$0xf]  ;;  %s459_s16 = scalar_lea.vmem %s1591_s3, %s1445_s15  ;;  %s1315_s15 = smov 24  }
  0x1e   : > { %567 = vmatpush.bf16.msra.mxu2 %v1149_v7  ;;  %v1229_v10 = vld [vmem:[%s1593_s5] ss:$0 sm:$0xff] }
  0x1f   : > { %1114 = vmatmul.msk.bf16.vlgmr.msra.gmra.mxu1 %vm484_vm0, %v462_v4  ;;  %v573_v28 = vld [vmem:[%s459_s16] sm:$0xf]  ;;  %s1142_s16 = sshll.u32 %s1404_s25, 3  ;;  %s978_s25 = scalar_lea.sflag [#allocation3], %s441_s29 }
  0x20   : > { %1105 = vmatmul.msk.bf16.vlgmr.msra.gmra.mxu0 %vm484_vm0, %v461_v5  ;;  %v574_v29 = vunpack.c.l.bf16 %v573_v28  ;;  %v1230_v36 = vld [vmem:[%s1597_s9] ss:$0 sm:$0xff] }
  0x21   : > { %1123 = vmatmul.msk.bf16.vlgmr.msra.gmra.mxu2 %vm484_vm0, %v463_v8 }
  0x22   : > { %vm1492_vm2 = vcmp.eq.f32.partialorder %v574_v29, 0.0 }
  0x9c   : > { %v533_v11 = vpop.f32.mrf.mxu1 }
  0x9d   : > { %v497_v12 = vpop.f32.mrf.mxu0  ;;  %v534_v13 = vadd.f32 %v1228_v9, %v533_v11 }
  0x9e   : > { %v498_v14 = vadd.f32 %v1229_v10, %v497_v12 }
  0x9f   : > { %v577_v15 = vpack.c.bf16 %v534_v13, %v534_v13 }
  0xa0   : > { %v576_v16 = vpack.c.bf16 %v498_v14, %v498_v14 }
  0xa1   : > { %712 = vrot.lane.b32.xlu1 %v577_v15, %s1312_s26  ;;  %645 = vrot.lane.b32.xlu0 %v577_v15, %s1313_s30  ;;  %v584_v17 = vsel %vm579_vm1, %v577_v15, 0 }
  0xa2   : > { %593 = vmatpush.bf16.xpose.msra.mxu3 %v584_v17  ;;  %710 = vrot.lane.b32.xlu2 %v576_v16, %s1312_s26 }
  0xa4   : > { %v535_v18 = vpop.f32.mrf.mxu1  ;;  %v569_v30 = vpop.f32.mrf.mxu2 }
  0xa5   : > { %v499_v19 = vpop.f32.mrf.mxu0  ;;  %v570_v39 = vadd.f32 %v1230_v36, %v569_v30 }
  0xa7   : > { %v578_v42 = vpack.c.bf16 %v570_v39, %v570_v39 }
  0xa9   : > { %778 = vrot.lane.b32.xlu1 %v577_v15, %s1314_s28  ;;  %642 = vrot.lane.b32.xlu0 %v576_v16, %s1313_s30  ;;  %v626_v45 = vsel %vm624_vm3, %v578_v42, 0 }
  0xaa   : > { %1124 = vmatmul.msk.bf16.vlgmr.msra.gmra.mxu3 %vm579_vm1, %v576_v16  ;;  %776 = vrot.lane.b32.xlu2 %v576_v16, %s1314_s28 }
  0xab   : > { %635 = vmatpush.bf16.msrb.mxu0 %v626_v45 }
  0xac   : > { %v571_v40 = vpop.f32.mrf.mxu2 }
  0xb1   : > { %689 = vrot.lane.b32.xlu0 %v578_v42, %s1313_s30  ;;  %821 = vrot.lane.b32.xlu1 %v578_v42, %s1314_s28  ;;  %s443_s30 = scalar_lea.vmem [#allocation2], %s1092_s17  ;;  %s1268_s17 = scalar_lea.hbm %s1600_s12, 16 }
  0xb2   : > { %755 = vrot.lane.b32.xlu2 %v578_v42, %s1312_s26  ;;  %s990_s28 = sshll.u32 %s443_s30, 4  ;;  %s991_s28 = int_to_ptr.vmem [resolvable:$true] %s990_s28 }
  0xfc   : > { %v711_v24 = vpop.permute.xlu2 %710 }
 0x104   : > { %v777_v31 = vpop.permute.xlu2 %776 }
 0x10c   : > { %v756_v62 = vpop.permute.xlu2 %755 }
 0x10d   : > { %v761_v63 = vsel %vm624_vm3, %v756_v62, 0 }
 0x10e   : > { %770 = vmatpush.bf16.msra.mxu0 %v761_v63 }
 0x113   : > { %v713_v20 = vpop.permute.xlu1 %712  ;;  %v646_v21 = vpop.permute.xlu0 %645 }
 0x114   : > { %v651_v22 = vsel %vm579_vm1, %v646_v21, 0  ;;  %v718_v23 = vsel %vm579_vm1, %v713_v20, 0 }
 0x115   : > { %660 = vmatpush.bf16.xpose.msrb.mxu1 %v651_v22  ;;  %727 = vmatpush.bf16.xpose.msrb.mxu3 %v718_v23 }
 0x11b   : > { %v779_v25 = vpop.permute.xlu1 %778  ;;  %v643_v26 = vpop.permute.xlu0 %642 }
 0x11c   : > { %v784_v27 = vsel %vm579_vm1, %v779_v25, 0  ;;  %1126 = vmatmul.msk.bf16.vlgmr.msrb.gmra.mxu1 %vm579_vm1, %v643_v26  ;;  %1128 = vmatmul.msk.bf16.vlgmr.msrb.gmra.mxu3 %vm579_vm1, %v711_v24 }
 0x11d   : > { %793 = vmatpush.bf16.xpose.msra.mxu1 %v784_v27 }
 0x123   : > { %v690_v19 = vpop.permute.xlu0 %689  ;;  %v822_v21 = vpop.permute.xlu1 %821 }
 0x124   : > { %v695_v22 = vsel %vm624_vm3, %v690_v19, 0  ;;  %v827_v26 = vsel %vm624_vm3, %v822_v21, 0 }
 0x125   : > { %704 = vmatpush.bf16.msrb.mxu2 %v695_v22 }
 0x129   : > { %836 = vmatpush.bf16.msra.mxu2 %v827_v26 }
 0x12c   : > { %1130 = vmatmul.msk.bf16.vlgmr.msra.gmra.mxu1 %vm579_vm1, %v777_v31 }
 0x12d   : > { %v595_v33 = vpop.f32.mrf.mxu3 }
 0x12e   : > { %v599_v34 = vmul.f32 0.35355338, %v595_v33 }
 0x130   : > { %v600_v35 = vsel %vm1492_vm2, -1e+09, %v599_v34 }
 0x131   : > { %v601_v37 = vsel %vm579_vm1, %v600_v35, -inf }
 0x132   : > { %v602_v38 = vrot.slane %v601_v37, 4 }
 0x134   : > { %v603_v41 = vmax.f32 %v601_v37, %v602_v38 }
 0x135   : > { %v597_v43 = vpop.f32.mrf.mxu3 }
 0x136   : > { %v604_v44 = vrot.slane %v603_v41, 2 }
 0x138   : > { %v605_v46 = vmax.f32 %v603_v41, %v604_v44 }
 0x13a   : > { %v606_v47 = vrot.slane %v605_v46, 1 }
 0x13c   : > { %v607_v48 = vmax.f32 %v605_v46, %v606_v47 }
 0x13e   : > { %v608_v49 = vsub.f32 %v600_v35, %v607_v48 }
 0x140   : > { %v609_v50 = vmul.f32 1.442695, %v608_v49 }
 0x142   : > { %1232 = vpow2.f32 %v609_v50 }
 0x148   : > { %v1233_v51 = vpop.eup %1232 }
 0x149   : > { %v611_v52 = vsel %vm579_vm1, %v1233_v51, 0.0 }
 0x14a   : > { %v612_v53 = vrot.slane %v611_v52, 4 }
 0x14c   : > { %v613_v54 = vadd.f32 %v612_v53, %v611_v52 }
 0x14e   : > { %v614_v55 = vrot.slane %v613_v54, 2 }
 0x150   : > { %v615_v56 = vadd.f32 %v614_v55, %v613_v54 }
 0x152   : > { %v616_v57 = vrot.slane %v615_v56, 1 }
 0x154   : > { %v617_v58 = vadd.f32 %v616_v57, %v615_v56 }
 0x156   : > { %1234 = vrcp.f32 %v617_v58 }
 0x15c   : > { %v1235_v59 = vpop.eup %1234 }
 0x15d   : > { %v619_v60 = vmul.f32 %v1235_v59, %v1233_v51 }
 0x15f   : > { %v620_v61 = vpack.c.bf16 %v619_v60, %v619_v60 }
 0x161   : > { %1125 = vmatmul.msk.bf16.vlgmr.msrb.gmra.mxu0 %vm579_vm1, %v620_v61 }
 0x199   : > { %v662_v0 = vpop.f32.mrf.mxu1 }
 0x19a   : > { %v666_v1 = vmul.f32 0.35355338, %v662_v0 }
 0x19c   : > { %v667_v2 = vsel %vm1492_vm2, -1e+09, %v666_v1 }
 0x19d   : > { %v668_v3 = vsel %vm579_vm1, %v667_v2, -inf }
 0x19e   : > { %v669_v4 = vrot.slane %v668_v3, 4 }
 0x19f   : > { %v729_v5 = vpop.f32.mrf.mxu3 }
 0x1a0   : > { %v670_v6 = vmax.f32 %v668_v3, %v669_v4  ;;  %v733_v7 = vmul.f32 0.35355338, %v729_v5 }
 0x1a1   : > { %v664_v8 = vpop.f32.mrf.mxu1 }
 0x1a2   : > { %v671_v9 = vrot.slane %v670_v6, 2  ;;  %v734_v10 = vsel %vm1492_vm2, -1e+09, %v733_v7 }
 0x1a3   : > { %v735_v11 = vsel %vm579_vm1, %v734_v10, -inf }
 0x1a4   : > { %v672_v12 = vmax.f32 %v670_v6, %v671_v9  ;;  %v736_v13 = vrot.slane %v735_v11, 4 }
 0x1a6   : > { %v673_v14 = vrot.slane %v672_v12, 1  ;;  %v737_v15 = vmax.f32 %v735_v11, %v736_v13 }
 0x1a7   : > { %v731_v16 = vpop.f32.mrf.mxu3 }
 0x1a8   : > { %v674_v17 = vmax.f32 %v672_v12, %v673_v14  ;;  %v738_v18 = vrot.slane %v737_v15, 2 }
 0x1a9   : > { %v795_v20 = vpop.f32.mrf.mxu1 }
 0x1aa   : > { %v675_v23 = vsub.f32 %v667_v2, %v674_v17  ;;  %v739_v24 = vmax.f32 %v737_v15, %v738_v18  ;;  %v799_v25 = vmul.f32 0.35355338, %v795_v20 }
 0x1ac   : > { %v676_v27 = vmul.f32 1.442695, %v675_v23  ;;  %v740_v28 = vrot.slane %v739_v24, 1  ;;  %v800_v29 = vsel %vm1492_vm2, -1e+09, %v799_v25 }
 0x1ad   : > { %v801_v30 = vsel %vm579_vm1, %v800_v29, -inf }
 0x1ae   : > { %1236 = vpow2.f32 %v676_v27  ;;  %v741_v31 = vmax.f32 %v739_v24, %v740_v28  ;;  %v802_v33 = vrot.slane %v801_v30, 4 }
 0x1b0   : > { %v742_v34 = vsub.f32 %v734_v10, %v741_v31  ;;  %v803_v35 = vmax.f32 %v801_v30, %v802_v33 }
 0x1b1   : > { %v797_v36 = vpop.f32.mrf.mxu1 }
 0x1b2   : > { %v743_v37 = vmul.f32 1.442695, %v742_v34  ;;  %v804_v38 = vrot.slane %v803_v35, 2 }
 0x1b4   : > { %v1237_v39 = vpop.eup %1236  ;;  %1238 = vpow2.f32 %v743_v37  ;;  %v805_v40 = vmax.f32 %v803_v35, %v804_v38 }
 0x1b5   : > { %v678_v41 = vsel %vm579_vm1, %v1237_v39, 0.0 }
 0x1b6   : > { %v679_v42 = vrot.slane %v678_v41, 4  ;;  %v806_v43 = vrot.slane %v805_v40, 1 }
 0x1b8   : > { %v680_v44 = vadd.f32 %v679_v42, %v678_v41  ;;  %v807_v32 = vmax.f32 %v805_v40, %v806_v43  ;;  %v1151_v40 = vld [vmem:[%s1598_s10] sm:$0xff] }
 0x1ba   : > { %v1239_v45 = vpop.eup %1238  ;;  %v681_v46 = vrot.slane %v680_v44, 2  ;;  %v808_v47 = vsub.f32 %v800_v29, %v807_v32 }
 0x1bb   : > { %v745_v48 = vsel %vm579_vm1, %v1239_v45, 0.0 }
 0x1bc   : > { %v682_v49 = vadd.f32 %v681_v46, %v680_v44  ;;  %v746_v50 = vrot.slane %v745_v48, 4  ;;  %v809_v51 = vmul.f32 1.442695, %v808_v47 }
 0x1be   : > { %v683_v52 = vrot.slane %v682_v49, 1  ;;  %v747_v53 = vadd.f32 %v746_v50, %v745_v48  ;;  %1240 = vpow2.f32 %v809_v51 }
 0x1c0   : > { %v748_v54 = vrot.slane %v747_v53, 2  ;;  %v684_v55 = vadd.f32 %v683_v52, %v682_v49 }
 0x1c2   : > { %v749_v56 = vadd.f32 %v748_v54, %v747_v53  ;;  %1242 = vrcp.f32 %v684_v55 }
 0x1c4   : > { %v1241_v57 = vpop.eup %1240  ;;  %v750_v58 = vrot.slane %v749_v56, 1 }
 0x1c5   : > { %v811_v59 = vsel %vm579_vm1, %v1241_v57, 0.0 }
 0x1c6   : > { %v751_v60 = vadd.f32 %v750_v58, %v749_v56  ;;  %v812_v61 = vrot.slane %v811_v59, 4 }
 0x1c8   : > { %v1243_v62 = vpop.eup %1242  ;;  %1244 = vrcp.f32 %v751_v60  ;;  %v813_v63 = vadd.f32 %v812_v61, %v811_v59 }
 0x1c9   : > { %v686_v0 = vmul.f32 %v1243_v62, %v1237_v39  ;;  %v1152_v39 = vld [vmem:[%s1598_s10 + $0x8] sm:$0xff] }
 0x1ca   : > { %v814_v1 = vrot.slane %v813_v63, 2  ;;  %969 = vmatpush.bf16.msra.mxu3 %v1152_v39 }
 0x1cb   : > { %v687_v2 = vpack.c.bf16 %v686_v0, %v686_v0 }
 0x1cc   : > { %v815_v3 = vadd.f32 %v814_v1, %v813_v63 }
 0x1cd   : > { %1127 = vmatmul.msk.bf16.vlgmr.msrb.gmra.mxu2 %vm579_vm1, %v687_v2 }
 0x1ce   : > { %v1245_v4 = vpop.eup %1244  ;;  %v816_v5 = vrot.slane %v815_v3, 1  ;;  %970 = vmatpush.bf16.msra.mxu3 %v1151_v40 }
 0x1cf   : > { %v753_v6 = vmul.f32 %v1245_v4, %v1239_v45 }
 0x1d0   : > { %v817_v7 = vadd.f32 %v816_v5, %v815_v3 }
 0x1d1   : > { %v754_v8 = vpack.c.bf16 %v753_v6, %v753_v6 }
 0x1d2   : > { %1246 = vrcp.f32 %v817_v7 }
 0x1d3   : > { %1129 = vmatmul.msk.bf16.vlgmr.msra.gmra.mxu0 %vm579_vm1, %v754_v8 }
 0x1d8   : > { %v1247_v9 = vpop.eup %1246 }
 0x1d9   : > { %v819_v10 = vmul.f32 %v1247_v9, %v1241_v57 }
 0x1db   : > { %v820_v11 = vpack.c.bf16 %v819_v10, %v819_v10 }
 0x1dd   : > { %1131 = vmatmul.msk.bf16.vlgmr.msra.gmra.mxu2 %vm579_vm1, %v820_v11 }
 0x1de   : > { %v637_v12 = vpop.f32.mrf.mxu0 }
 0x1df   : > { %v843_v14 = vrot.slane %v637_v12, 1  ;;  %v847_v15 = vrot.slane %v637_v12, 2  ;;  %v851_v18 = vrot.slane %v637_v12, 3 }
 0x1e6   : > { %v639_v13 = vpop.f32.mrf.mxu0 }
 0x250   : > { %v706_v16 = vpop.f32.mrf.mxu2  ;;  %v1526_v17 = vpop.f32.mrf.mxu0 }
 0x251   : > { %v861_v19 = vrot.slane %v706_v16, 1  ;;  %v865_v20 = vrot.slane %v706_v16, 2  ;;  %v869_v21 = vrot.slane %v706_v16, 3  ;;  %v877_v27 = vrot.slane %v1526_v17, 1 }
 0x252   : > { %v881_v28 = vrot.slane %v1526_v17, 2  ;;  %v885_v30 = vrot.slane %v1526_v17, 3 }
 0x253   : > { %v1208_v22 = vpack.i.bf16 %v869_v21, %v851_v18  ;;  %v1203_v23 = vpack.i.bf16 %v865_v20, %v847_v15  ;;  %v1198_v24 = vpack.i.bf16 %v861_v19, %v843_v14  ;;  %v1231_v21 = vld [vmem:[%s1599_s11] ss:$0 sm:$0xff] }
 0x255   : > { %1209 = vrot.lane.b32.xlu2 %v1208_v22, %s1315_s15  ;;  %1204 = vrot.lane.b32.xlu1 %v1203_v23, %s1316_s19 }
 0x256   : > { %1199 = vrot.lane.b32.xlu0 %v1198_v24, %s1317_s20 }
 0x258   : > { %v708_v25 = vpop.f32.mrf.mxu2  ;;  %v774_v26 = vpop.f32.mrf.mxu0 }
 0x260   : > { %v838_v29 = vpop.f32.mrf.mxu2 }
 0x261   : > { %v893_v31 = vrot.slane %v838_v29, 1  ;;  %v897_v33 = vrot.slane %v838_v29, 2  ;;  %v901_v34 = vrot.slane %v838_v29, 3 }
 0x263   : > { %v1223_v35 = vpack.i.bf16 %v901_v34, %v885_v30  ;;  %v1218_v36 = vpack.i.bf16 %v897_v33, %v881_v28  ;;  %v1213_v37 = vpack.i.bf16 %v893_v31, %v877_v27 }
 0x265   : > { %1224 = vrot.lane.b32.xlu2 %v1223_v35, %s1315_s15  ;;  %1219 = vrot.lane.b32.xlu1 %v1218_v36, %s1316_s19  ;;  %s988_s19 = scalar_lea.hbm %s1600_s12, %s1142_s16 }
 0x266   : > { %1214 = vrot.lane.b32.xlu0 %v1213_v37, %s1317_s20  ;;  %s992_s23 = sshll.u32 %s988_s19, 4  ;;  %s993_s23 = int_to_ptr.hbm [resolvable:$true] %s992_s23 }
 0x267   : > { %s1262_s0 = sshra.s32 %s993_s23, 4  ;;  %s1263_s0 = int_to_ptr.hbm [resolvable:$true] %s1262_s0 }
 0x268   : > { %v840_v38 = vpop.f32.mrf.mxu2  ;;  %s1264_s1 = scalar_lea.hbm %s1263_s0, 8  ;;  %p1269_p0 = scmp.lt.s32.totalorder %s1263_s0, %s1600_s12 }
 0x269   : > { %p1265_p11 = scmp.ne.s32.totalorder %s1263_s0, %s1264_s1  ;;  %p1270_p1 = scmp.lt.s32.totalorder %s1268_s17, %s1264_s1 }
 0x26b   : > { %p1266_p12 = pnand %p1265_p11, %p1421_p5  ;;  %p1271_p2 = por %p1270_p1, %p1269_p0 }
 0x26d   : > { %p1267_p13 = pneg %p1266_p12 }
 0x26f   : > { %p1272_p3 = pnand %p1271_p2, %p1267_p13 }
 0x2af   : > { %v1210_v46 = vpop.permute.xlu2 %1209 }
 0x2b0   : > { %v1211_v50 = vunpack.i.l.bf16 %v1210_v46  ;;  %v1212_v53 = vunpack.i.h.bf16 %v1210_v46 }
 0x2bf   : > { %v1225_v57 = vpop.permute.xlu2 %1224 }
 0x2c0   : > { %v1227_v1 = vunpack.i.h.bf16 %v1225_v57  ;;  %v1226_v2 = vunpack.i.l.bf16 %v1225_v57 }
 0x2c7   : > { %v1205_v41 = vpop.permute.xlu1 %1204 }
 0x2c8   : > { %v1200_v42 = vpop.permute.xlu0 %1199  ;;  %v1206_v44 = vunpack.i.l.bf16 %v1205_v41  ;;  %v1207_v47 = vunpack.i.h.bf16 %v1205_v41 }
 0x2c9   : > { %v1201_v43 = vunpack.i.l.bf16 %v1200_v42  ;;  %v1202_v32 = vunpack.i.h.bf16 %v1200_v42 }
 0x2cb   : > { %v855_v45 = vsel %vm579_vm1, %v637_v12, %v1201_v43  ;;  %v873_v48 = vsel %vm579_vm1, %v706_v16, %v1202_v32 }
 0x2cc   : > { %v857_v49 = vsel %vm856_vm4, %v855_v45, %v1206_v44  ;;  %v874_v51 = vsel %vm856_vm4, %v873_v48, %v1207_v47 }
 0x2cd   : > { %v859_v52 = vsel %vm858_vm5, %v857_v49, %v1211_v50  ;;  %v875_v54 = vsel %vm858_vm5, %v874_v51, %v1212_v53 }
 0x2ce   : > { %v909_v55 = vrot.slane %v859_v52, 3  ;;  %v912_v58 = vrot.slane %v875_v54, 6  ;;  %v914_v8 = vrot.slane %v875_v54, 1 }
 0x2d0   : > { %v927_v62 = vsel %vm926_vm6, %v859_v52, %v909_v55 }
 0x2d1   : > { %v929_v5 = vsel %vm928_vm7, %v927_v62, %v912_v58 }
 0x2d2   : > { %v931_v13 = vsel %vm930_vm8, %v929_v5, %v914_v8 }
 0x2d7   : > { %v1220_v56 = vpop.permute.xlu1 %1219 }
 0x2d8   : > { %v1222_v59 = vunpack.i.h.bf16 %v1220_v56  ;;  %v1221_v60 = vunpack.i.l.bf16 %v1220_v56  ;;  %v1215_v61 = vpop.permute.xlu0 %1214 }
 0x2d9   : > { %v1217_v63 = vunpack.i.h.bf16 %v1215_v61  ;;  %v1216_v0 = vunpack.i.l.bf16 %v1215_v61 }
 0x2db   : > { %v905_v3 = vsel %vm579_vm1, %v838_v29, %v1217_v63  ;;  %v889_v4 = vsel %vm579_vm1, %v1526_v17, %v1216_v0 }
 0x2dc   : > { %v906_v6 = vsel %vm856_vm4, %v905_v3, %v1222_v59  ;;  %v890_v7 = vsel %vm856_vm4, %v889_v4, %v1221_v60 }
 0x2dd   : > { %v907_v9 = vsel %vm858_vm5, %v906_v6, %v1227_v1  ;;  %v891_v10 = vsel %vm858_vm5, %v890_v7, %v1226_v2 }
 0x2de   : > { %v917_v11 = vrot.slane %v891_v10, 4  ;;  %v919_v12 = vrot.slane %v891_v10, 7  ;;  %v922_v14 = vrot.slane %v907_v9, 2  ;;  %v924_v16 = vrot.slane %v907_v9, 5 }
 0x2e0   : > { %v932_v15 = vsel %vm624_vm3, %v931_v13, %v917_v11 }
 0x2e1   : > { %v934_v17 = vsel %vm933_vm9, %v932_v15, %v919_v12 }
 0x2e2   : > { %v936_v18 = vsel %vm935_vm10, %v934_v17, %v922_v14 }
 0x2e3   : > { %v938_v19 = vsel %vm937_vm11, %v936_v18, %v924_v16 }
 0x2e4   : > { %v939_v20 = vpack.c.bf16 %v938_v19, %v938_v19 }
 0x2e6   : > { %1140 = vmatmul.msk.bf16.vlgmr.msra.gmra.mxu3 %vm484_vm0, %v939_v20 }
 0x369   : > { %v972_v22 = vpop.f32.mrf.mxu3 }
 0x36a   : > { %v973_v23 = vadd.f32 %v1231_v21, %v972_v22 }
 0x36c   : > { %976 = vst.msk [vmem:[%s443_s30] sm:$0xff] %vm484_vm0, %v973_v23 }
 0x36d   : > { %1275 = shalt.err (!%p1272_p3)
}
 0x36e   : > { %1153 = dma.vmem_to_hbm [thread:$0]  (%p1421_p5), %s991_s28, 128, %s993_s23, %s978_s25  }
 0x371   : > { %v974_v24 = vpop.f32.mrf.mxu3 }
 0x372 PF: > { %p1159_p4 = scmp.ge.s32.totalorder %s1310_s24, 2  ;;  %s1004_s29 = sand.u32 1, %s1298_s21  }
 0x373   : > { %s1005_s20 = scalar_lea.sflag [#allocation3], %s1004_s29 }
 0x374   : > { %p1156_p7 = pnand %p1159_p4, %p1425_p6 }
 0x376   : > { %p1157_p8 = pneg %p1156_p7 }
 0x378   : > { %1293 = dma.done.wait (%p1157_p8), %s1005_s20, 128  }
 0x379   : > { %1295 = vsyncadd (%p1157_p8), %s1005_s20, 4294967168  ;;  %s1612_s0 = sld [smem:[#allocation5_spill]]  ;;  %p22_p9 = scmp.ge.s32.totalorder %s1408_s27, 4  }
 0x37a   : > { %s1613_s23 = sld [smem:[#allocation6_spill]]  ;;  %s1614_s21 = smov %s1302_s22 }
 0x37b   : > { %s1616_s24 = smov %s1408_s27  ;;  %24 = sbr.rel (!%p22_p9) target bundleno = 6 (0x6), region = 112 }
 0x37f   : > { %s1615_s22 = smov %s1612_s0 }
 0x380   :  { %1011 = vsyncpa [#allocation3], 1 }
 0x381   :  { %1013 = vsyncpa [#allocation3 + $0x1], 1 }

</bundles_post_ra>
